<compile_context>
chip_gen: v6e
topology: v6e:2x2x1
jax: 0.10.0
libtpu: 0.0.40
codegen_flags: <defaults>
</compile_context>

<pallas_src>
import jax
import jax.numpy as jnp
from jax.experimental import pallas as pl
from jax.experimental.pallas import tpu as pltpu

N_EMBD = 32
HIDDEN = 4 * N_EMBD           # 128
LANES = 128                   # TPU lane width
PACK = LANES // N_EMBD        # 4 tokens per 128-lane row
DEFAULT_TILE_R = 512          # packed rows per tile -> 2048 tokens per grid step


def _round_up(a, b):
    return (a + b - 1) // b * b


def _block_diag(w, pack):
    """(cin, cout) -> (pack*cin, pack*cout) block-diagonal expansion."""
    cin, cout = w.shape
    eye = jnp.eye(pack, dtype=w.dtype)
    return jnp.einsum("pq,io->piqo", eye, w).reshape(pack * cin, pack * cout)


def ffn_kernel(x_ref, w1_ref, b1_ref, w2_ref, b2_ref, o_ref):
    # x_ref: (TILE_R, 128) f32   -- 4 packed tokens per row
    # w1_ref: (128, 512) bf16, b1_ref: (1, 512) f32
    # w2_ref: (512, 128) bf16, b2_ref: (1, 128) f32
    x = x_ref[...]
    # bf16 operands for the MXU, f32 accumulation; bias/ReLU stay f32 (v5e VPU has no bf16).
    h = jnp.dot(x.astype(jnp.bfloat16), w1_ref[...],
                preferred_element_type=jnp.float32) + b1_ref[...]
    h = jnp.maximum(h, 0.0)  # ReLU
    out = jnp.dot(h.astype(jnp.bfloat16), w2_ref[...],
                  preferred_element_type=jnp.float32) + b2_ref[...]
    # Dropout(p=0.2) in eval mode is the identity.
    o_ref[...] = out.astype(o_ref.dtype)


def feed_forward(x, w1, b1, w2, b2, *, tile_r=DEFAULT_TILE_R):
    """x: (B, T, C) float32 -> (B, T, C) float32.  w1:(C,4C) b1:(1,4C) w2:(4C,C) b2:(1,C)."""
    B, T, C = x.shape
    assert C == N_EMBD and LANES % C == 0
    H = w1.shape[1]
    M = B * T

    # Pack 4 tokens per 128-lane row (lane-dense HBM I/O); pad so the packed row
    # count is a multiple of the row tile (tile_r is kept a multiple of 8 sublanes).
    tile_r = min(tile_r, _round_up(pl.cdiv(M, PACK), 8))
    m_pad = _round_up(M, PACK * tile_r)
    R = m_pad // PACK

    x2d = x.reshape(M, C)
    if m_pad != M:
        x2d = jnp.pad(x2d, ((0, m_pad - M), (0, 0)))
    xp = x2d.reshape(R, PACK * C)                       # (R, 128), lane-dense

    # Block-diagonal weights so the packed layout is a plain matmul; cast to bf16 once.
    w1b = _block_diag(w1, PACK).astype(jnp.bfloat16)    # (128, 512)
    w2b = _block_diag(w2, PACK).astype(jnp.bfloat16)    # (512, 128)
    b1b = jnp.tile(b1.reshape(1, H), (1, PACK))         # (1, 512) f32
    b2b = jnp.tile(b2.reshape(1, C), (1, PACK))         # (1, 128) f32

    grid = (R // tile_r,)
    out_p = pl.pallas_call(
        ffn_kernel,
        out_shape=jax.ShapeDtypeStruct((R, PACK * C), x.dtype),
        grid=grid,
        in_specs=[
            pl.BlockSpec((tile_r, PACK * C), lambda i: (i, 0)),     # x tile
            pl.BlockSpec((PACK * C, PACK * H), lambda i: (0, 0)),   # w1 (resident)
            pl.BlockSpec((1, PACK * H), lambda i: (0, 0)),          # b1 (resident)
            pl.BlockSpec((PACK * H, PACK * C), lambda i: (0, 0)),   # w2 (resident)
            pl.BlockSpec((1, PACK * C), lambda i: (0, 0)),          # b2 (resident)
        ],
        out_specs=pl.BlockSpec((tile_r, PACK * C), lambda i: (i, 0)),
        compiler_params=pltpu.CompilerParams(
            dimension_semantics=("parallel",),  # independent row tiles -> megacore on v7x
        ),
    )(xp, w1b, b1b, w2b, b2b)

    out2d = out_p.reshape(m_pad, C)[:M]
    return out2d.reshape(B, T, C)


def init_params(key, n_embd):
    """Deterministic init mimicking PyTorch nn.Linear defaults (uniform +/- 1/sqrt(fan_in))."""
    k1, k2, k3, k4 = jax.random.split(key, 4)
    hidden = 4 * n_embd
    bound1 = 1.0 / jnp.sqrt(n_embd)
    bound2 = 1.0 / jnp.sqrt(hidden)
    # stored as (in, out) so the kernel computes x @ W + b
    w1 = jax.random.uniform(k1, (n_embd, hidden), jnp.float32, -bound1, bound1)
    b1 = jax.random.uniform(k2, (1, hidden), jnp.float32, -bound1, bound1)
    w2 = jax.random.uniform(k3, (hidden, n_embd), jnp.float32, -bound2, bound2)
    b2 = jax.random.uniform(k4, (1, n_embd), jnp.float32, -bound2, bound2)
    return w1, b1, w2, b2


if __name__ == "__main__":
    key = jax.random.PRNGKey(0)
    k_x, k_p = jax.random.split(key)

    B, T, C = 2, 8, N_EMBD
    x = jax.random.normal(k_x, (B, T, C), jnp.float32)
    w1, b1, w2, b2 = init_params(k_p, C)

    out = feed_forward(x, w1, b1, w2, b2)
    out = jax.block_until_ready(out)

    # Pure-JAX reference with matching bf16-operand / f32-accumulate semantics
    # (eval-mode dropout = identity).
    xb = x.reshape(-1, C).astype(jnp.bfloat16)
    h_ref = jnp.dot(xb, w1.astype(jnp.bfloat16), preferred_element_type=jnp.float32) + b1
    h_ref = jnp.maximum(h_ref, 0.0)
    ref = jnp.dot(h_ref.astype(jnp.bfloat16), w2.astype(jnp.bfloat16),
                  preferred_element_type=jnp.float32) + b2
    ref = ref.reshape(B, T, C)

    assert out.shape == (B, T, C)
    assert jnp.allclose(out, ref, atol=2e-3, rtol=2e-3), float(jnp.max(jnp.abs(out - ref)))

    print("KERNEL_OK")
</pallas_src>

<mosaic_0001>
module attributes {stable_mosaic.version = 11 : i64} {
  func.func @ffn_kernel(%arg0: i32, %arg1: memref<8x128xf32, #tpu.memory_space<vmem>>, %arg2: memref<128x512xbf16, #tpu.memory_space<vmem>>, %arg3: memref<1x512xf32, #tpu.memory_space<vmem>>, %arg4: memref<512x128xbf16, #tpu.memory_space<vmem>>, %arg5: memref<1x128xf32, #tpu.memory_space<vmem>>, %arg6: memref<8x128xf32, #tpu.memory_space<vmem>>) attributes {dimension_semantics = [#tpu.dimension_semantics<parallel>], iteration_bounds = array<i64: 1>, scalar_prefetch = 0 : i64, scratch_operands = 0 : i64, tpu.core_type = #tpu.core_type<tc>, window_params = [{transform_indices = @transform_0, window_bounds = array<i64: 8, 128>}, {pipeline_mode = #tpu.pipeline_mode<synchronous>, transform_indices = @transform_1, window_bounds = array<i64: 128, 512>}, {pipeline_mode = #tpu.pipeline_mode<synchronous>, transform_indices = @transform_2, window_bounds = array<i64: 1, 512>}, {pipeline_mode = #tpu.pipeline_mode<synchronous>, transform_indices = @transform_3, window_bounds = array<i64: 512, 128>}, {pipeline_mode = #tpu.pipeline_mode<synchronous>, transform_indices = @transform_4, window_bounds = array<i64: 1, 128>}, {transform_indices = @transform_5, window_bounds = array<i64: 8, 128>}]} {
    %c0 = arith.constant 0 : index
    %c0_0 = arith.constant 0 : index
    %0 = vector.load %arg1[%c0, %c0_0] : memref<8x128xf32, #tpu.memory_space<vmem>>, vector<8x128xf32>
    %1 = arith.truncf %0 : vector<8x128xf32> to vector<8x128xbf16>
    %c0_1 = arith.constant 0 : index
    %c0_2 = arith.constant 0 : index
    %2 = vector.load %arg2[%c0_1, %c0_2] : memref<128x512xbf16, #tpu.memory_space<vmem>>, vector<128x512xbf16>
    %cst = arith.constant dense<0.000000e+00> : vector<8x512xf32>
    %3 = tpu.matmul %1, %2, %cst {dimension_numbers = #tpu.dot_dimension_numbers<[1], [0], [0], [1], [0, 0, 1, 1], [], []>} : vector<8x128xbf16>, vector<128x512xbf16>, vector<8x512xf32> -> vector<8x512xf32>
    %c0_3 = arith.constant 0 : index
    %c0_4 = arith.constant 0 : index
    %4 = vector.load %arg3[%c0_3, %c0_4] : memref<1x512xf32, #tpu.memory_space<vmem>>, vector<1x512xf32>
    %5 = vector.broadcast %4 : vector<1x512xf32> to vector<8x512xf32>
    %6 = arith.addf %3, %5 : vector<8x512xf32>
    %cst_5 = arith.constant 0.000000e+00 : f32
    %7 = vector.broadcast %cst_5 : f32 to vector<8x512xf32>
    %8 = arith.maximumf %6, %7 : vector<8x512xf32>
    %9 = arith.truncf %8 : vector<8x512xf32> to vector<8x512xbf16>
    %c0_6 = arith.constant 0 : index
    %c0_7 = arith.constant 0 : index
    %10 = vector.load %arg4[%c0_6, %c0_7] : memref<512x128xbf16, #tpu.memory_space<vmem>>, vector<512x128xbf16>
    %cst_8 = arith.constant dense<0.000000e+00> : vector<8x128xf32>
    %11 = tpu.matmul %9, %10, %cst_8 {dimension_numbers = #tpu.dot_dimension_numbers<[1], [0], [0], [1], [0, 0, 1, 1], [], []>} : vector<8x512xbf16>, vector<512x128xbf16>, vector<8x128xf32> -> vector<8x128xf32>
    %c0_9 = arith.constant 0 : index
    %c0_10 = arith.constant 0 : index
    %12 = vector.load %arg5[%c0_9, %c0_10] : memref<1x128xf32, #tpu.memory_space<vmem>>, vector<1x128xf32>
    %13 = vector.broadcast %12 : vector<1x128xf32> to vector<8x128xf32>
    %14 = arith.addf %11, %13 : vector<8x128xf32>
    %c0_11 = arith.constant 0 : index
    %c0_12 = arith.constant 0 : index
    %15 = vector.load %arg6[%c0_11, %c0_12] : memref<8x128xf32, #tpu.memory_space<vmem>>, vector<8x128xf32>
    tpu.vector_store %arg6[%c0_11, %c0_12], %14 {strides = array<i32>} : memref<8x128xf32, #tpu.memory_space<vmem>>, vector<8x128xf32>,
    return
  }
  func.func @transform_0(%arg0: i32) -> (i32, i32) {
    %c0_i32 = arith.constant 0 : i32
    %c0_i32_0 = arith.constant 0 : i32
    return %arg0, %c0_i32 : i32, i32
  }
  func.func @transform_1(%arg0: i32) -> (i32, i32) {
    %c0_i32 = arith.constant 0 : i32
    %c0_i32_0 = arith.constant 0 : i32
    %c0_i32_1 = arith.constant 0 : i32
    return %c0_i32, %c0_i32_0 : i32, i32
  }
  func.func @transform_2(%arg0: i32) -> (i32, i32) {
    %c0_i32 = arith.constant 0 : i32
    %c0_i32_0 = arith.constant 0 : i32
    %c0_i32_1 = arith.constant 0 : i32
    return %c0_i32, %c0_i32_0 : i32, i32
  }
  func.func @transform_3(%arg0: i32) -> (i32, i32) {
    %c0_i32 = arith.constant 0 : i32
    %c0_i32_0 = arith.constant 0 : i32
    %c0_i32_1 = arith.constant 0 : i32
    return %c0_i32, %c0_i32_0 : i32, i32
  }
  func.func @transform_4(%arg0: i32) -> (i32, i32) {
    %c0_i32 = arith.constant 0 : i32
    %c0_i32_0 = arith.constant 0 : i32
    %c0_i32_1 = arith.constant 0 : i32
    return %c0_i32, %c0_i32_0 : i32, i32
  }
  func.func @transform_5(%arg0: i32) -> (i32, i32) {
    %c0_i32 = arith.constant 0 : i32
    %c0_i32_0 = arith.constant 0 : i32
    return %arg0, %c0_i32 : i32, i32
  }
}

</mosaic_0001>

<bundles_post_ra>
// kernel: tpu_custom_call.1
= control target key start
LH: loop header
LB: loop body
LE: loop exit
PB: predicated region body
PF: predicated region fallthrough
CT: control target
= control target key end

     0   :  { %10 = vsyncpa [#allocation3], 0  ;;  %s1105_s0 = inlined_call_operand.hbm [shape: f32[8,128], index: 0, kind: input, shape index: {}]   ;;  %s1106_s1 = inlined_call_operand.hbm [shape: bf16[128,512], index: 1, kind: input, shape index: {}]   ;;  %s1107_s2 = inlined_call_operand.hbm [shape: f32[1,512], index: 2, kind: input, shape index: {}]   ;;  %s1108_s3 = inlined_call_operand.hbm [shape: bf16[512,128], index: 3, kind: input, shape index: {}]   ;;  %s1109_s4 = inlined_call_operand.vmem [shape: f32[1,128], index: 4, kind: input, shape index: {}]   ;;  %s1110_s5 = inlined_call_operand.hbm [shape: f32[8,128], index: 5, kind: output, shape index: {}]  }
   0x1   :  { %11 = vsyncpa [#allocation6], 0 }
   0x2   :  { %12 = vsyncpa [#allocation9], 0 }
   0x3   :  { %13 = vsyncpa [#allocation4], 0  ;;  %s1047_s18 = smov [#allocation5]  }
   0x4   :  { %s29_s19 = sshll.u32 %s1047_s18, 4  ;;  %s30_s19 = int_to_ptr.vmem [resolvable:$true] %s29_s19 }
   0x5   :  { %s947_s20 = scalar_lea.vmem %s30_s19, 4096  ;;  %p952_p1 = scmp.lt.s32.totalorder %s30_s19, %s30_s19 }
   0x6   :  { %p948_p0 = scmp.ne.s32.totalorder %s30_s19, %s947_s20  ;;  %p953_p2 = scmp.lt.s32.totalorder %s947_s20, %s947_s20 }
   0x8   :  { %p954_p3 = por %p953_p2, %p952_p1 }
   0xa   :  { %p955_p4 = pnand %p954_p3, %p948_p0 }
   0xc   :  { %958 = shalt.err (!%p955_p4)
}
   0xd   :  { %s1048_s21 = smov 256   ;;  %s1049_s22 = smov 16  }
   0xe   :  { %35 = dma.hbm_to_vmem [thread:$0]  %s1106_s1, 4096, %s30_s19, [#allocation6], %s1048_s21, %s1048_s21, %s1049_s22  }
   0xf   :  { %s1050_s25 = smov [#allocation2]   ;;  %s1051_s27 = smov [#allocation7]  }
  0x10   :  { %s20_s26 = sshll.u32 %s1050_s25, 4  ;;  %s42_s28 = sshll.u32 %s1051_s27, 4  ;;  %s21_s26 = int_to_ptr.vmem [resolvable:$true] %s20_s26  ;;  %s43_s28 = int_to_ptr.vmem [resolvable:$true] %s42_s28 }
  0x11   :  { %s967_s29 = scalar_lea.vmem %s21_s26, 128  ;;  %p972_p6 = scmp.lt.s32.totalorder %s21_s26, %s21_s26 }
  0x12   :  { %p968_p5 = scmp.ne.s32.totalorder %s21_s26, %s967_s29  ;;  %p973_p7 = scmp.lt.s32.totalorder %s967_s29, %s967_s29 }
  0x14   :  { %p974_p8 = por %p973_p7, %p972_p6 }
  0x16   :  { %p975_p9 = pnand %p974_p8, %p968_p5 }
  0x18   :  { %978 = shalt.err (!%p975_p9)
}
  0x19   :  { %23 = dma.hbm_to_vmem [thread:$0]  %s1105_s0, 128, %s21_s26, [#allocation3]  }
  0x1a   :  { %s987_s7 = scalar_lea.vmem %s43_s28, 64  ;;  %p992_p11 = scmp.lt.s32.totalorder %s43_s28, %s43_s28 }
  0x1b   :  { %p988_p10 = scmp.ne.s32.totalorder %s43_s28, %s987_s7  ;;  %p993_p12 = scmp.lt.s32.totalorder %s987_s7, %s987_s7 }
  0x1d   :  { %p994_p13 = por %p993_p12, %p992_p11 }
  0x1f   :  { %p995_p0 = pnand %p994_p13, %p988_p10 }
  0x21   :  { %998 = shalt.err (!%p995_p0)
}
  0x22   :  { %45 = dma.hbm_to_vmem [thread:$0]  %s1107_s2, 64, %s43_s28, [#allocation6]  }
  0x23   :  { %s1052_s9 = smov [#allocation8]  }
  0x24   :  { %s51_s10 = sshll.u32 %s1052_s9, 4  ;;  %s52_s10 = int_to_ptr.vmem [resolvable:$true] %s51_s10 }
  0x25   :  { %s1007_s11 = scalar_lea.vmem %s52_s10, 4096  ;;  %p1012_p2 = scmp.lt.s32.totalorder %s52_s10, %s52_s10 }
  0x26   :  { %p1008_p1 = scmp.ne.s32.totalorder %s52_s10, %s1007_s11  ;;  %p1013_p3 = scmp.lt.s32.totalorder %s1007_s11, %s1007_s11 }
  0x28   :  { %p1014_p4 = por %p1013_p3, %p1012_p2 }
  0x2a   :  { %p1015_p5 = pnand %p1014_p4, %p1008_p1 }
  0x2c   :  { %1018 = shalt.err (!%p1015_p5)
}
  0x2d   :  { %s1053_s0 = smov 64   ;;  %s1054_s12 = smov 4  }
  0x2e   :  { %57 = dma.hbm_to_vmem [thread:$0]  %s1108_s3, 4096, %s52_s10, [#allocation9], %s1053_s0, %s1053_s0, %s1054_s12  }
  0x2f   :  { %1039 = dma.done.wait [#allocation3], 128  }
  0x30   :  { %1040 = vsyncadd [#allocation3], 4294967168 }
  0x31   :  { %1041 = dma.done.wait [#allocation6], 4160  }
  0x32   :  { %1042 = vsyncadd [#allocation6], 4294963136 }
  0x33   :  { %1043 = dma.done.wait [#allocation9], 4096  }
  0x34   :  { %1044 = vsyncadd [#allocation9], 4294963200  ;;  %v1055_v0 = vmov 0   ;;  %v859_v1 = vld [vmem:[#allocation5 + $0xe4] ss:$16 sps:$4 sm:$0xff]   ;;  %v73_v33 = vld [vmem:[#allocation2] sm:$0xff] }
  0x35   :  { %321 = vmatprep.mubr.bf16.mxu0 %v1055_v0  ;;  %362 = vmatprep.mubr.bf16.mxu1 %v1055_v0  ;;  %v861_v2 = vld [vmem:[#allocation5 + $0xec] ss:$16 sps:$4 sm:$0xff]   ;;  %v863_v3 = vld [vmem:[#allocation5 + $0xe0] ss:$16 sps:$4 sm:$0xff]   ;;  %v864_v4 = vld [vmem:[#allocation5 + $0xe8] ss:$16 sps:$4 sm:$0xff]   ;;  %v74_v37 = vpack.c.bf16 %v73_v33, %v73_v33 }
  0x36   :  { %289 = vmatprep.subr.bf16.mxu0 %v859_v1  ;;  %330 = vmatprep.subr.bf16.mxu1 %v861_v2  ;;  %v865_v5 = vld [vmem:[#allocation5 + $0xc4] ss:$16 sps:$4 sm:$0xff]   ;;  %v867_v6 = vld [vmem:[#allocation5 + $0xcc] ss:$16 sps:$4 sm:$0xff]   ;;  %v869_v7 = vld [vmem:[#allocation5 + $0xc0] ss:$16 sps:$4 sm:$0xff]  }
  0x37   :  { %290 = vmatpush1.bf16.msra.mxu0 %v863_v3  ;;  %331 = vmatpush1.bf16.msra.mxu1 %v864_v4  ;;  %v870_v8 = vld [vmem:[#allocation5 + $0xc8] ss:$16 sps:$4 sm:$0xff]   ;;  %v871_v9 = vld [vmem:[#allocation5 + $0xa4] ss:$16 sps:$4 sm:$0xff]   ;;  %v873_v10 = vld [vmem:[#allocation5 + $0xac] ss:$16 sps:$4 sm:$0xff]   ;;  %v109_v3 = vlaneseq }
  0x38   :  { %291 = vmatprep.subr.bf16.mxu0 %v865_v5  ;;  %332 = vmatprep.subr.bf16.mxu1 %v867_v6  ;;  %v875_v11 = vld [vmem:[#allocation5 + $0xa0] ss:$16 sps:$4 sm:$0xff]   ;;  %v876_v12 = vld [vmem:[#allocation5 + $0xa8] ss:$16 sps:$4 sm:$0xff]   ;;  %v877_v13 = vld [vmem:[#allocation5 + $0x84] ss:$16 sps:$4 sm:$0xff]  }
  0x39   :  { %v879_v14 = vld [vmem:[#allocation5 + $0x8c] ss:$16 sps:$4 sm:$0xff]   ;;  %v881_v15 = vld [vmem:[#allocation5 + $0x80] ss:$16 sps:$4 sm:$0xff]   ;;  %v882_v16 = vld [vmem:[#allocation5 + $0x88] ss:$16 sps:$4 sm:$0xff]  }
  0x3a   :  { %v883_v17 = vld [vmem:[#allocation5 + $0x64] ss:$16 sps:$4 sm:$0xff]   ;;  %v885_v18 = vld [vmem:[#allocation5 + $0x6c] ss:$16 sps:$4 sm:$0xff]   ;;  %v887_v19 = vld [vmem:[#allocation5 + $0x60] ss:$16 sps:$4 sm:$0xff]  }
  0x3b   :  { %292 = vmatpush1.bf16.msra.mxu0 %v869_v7  ;;  %333 = vmatpush1.bf16.msra.mxu1 %v870_v8  ;;  %v888_v20 = vld [vmem:[#allocation5 + $0x68] ss:$16 sps:$4 sm:$0xff]   ;;  %v889_v21 = vld [vmem:[#allocation5 + $0x44] ss:$16 sps:$4 sm:$0xff]   ;;  %v891_v22 = vld [vmem:[#allocation5 + $0x4c] ss:$16 sps:$4 sm:$0xff]  }
  0x3c   :  { %293 = vmatprep.subr.bf16.mxu0 %v871_v9  ;;  %334 = vmatprep.subr.bf16.mxu1 %v873_v10  ;;  %v893_v23 = vld [vmem:[#allocation5 + $0x40] ss:$16 sps:$4 sm:$0xff]   ;;  %v894_v24 = vld [vmem:[#allocation5 + $0x48] ss:$16 sps:$4 sm:$0xff]   ;;  %v895_v25 = vld [vmem:[#allocation5 + $0x24] ss:$16 sps:$4 sm:$0xff]  }
  0x3d   :  { %v897_v26 = vld [vmem:[#allocation5 + $0x2c] ss:$16 sps:$4 sm:$0xff]   ;;  %v899_v27 = vld [vmem:[#allocation5 + $0x20] ss:$16 sps:$4 sm:$0xff]   ;;  %v900_v28 = vld [vmem:[#allocation5 + $0x28] ss:$16 sps:$4 sm:$0xff]  }
  0x3e   :  { %v901_v29 = vld [vmem:[#allocation5 + $0x4] ss:$16 sps:$4 sm:$0xff]   ;;  %v903_v30 = vld [vmem:[#allocation5 + $0xc] ss:$16 sps:$4 sm:$0xff]   ;;  %v905_v31 = vld [vmem:[#allocation5] ss:$16 sps:$4 sm:$0xff]  }
  0x3f   :  { %294 = vmatpush1.bf16.msra.mxu0 %v875_v11  ;;  %335 = vmatpush1.bf16.msra.mxu1 %v876_v12  ;;  %v906_v32 = vld [vmem:[#allocation5 + $0x8] ss:$16 sps:$4 sm:$0xff]   ;;  %v907_v34 = vld [vmem:[#allocation8 + $0x78] sm:$0xff]   ;;  %v915_v43 = vld [vmem:[#allocation8 + $0x68] sm:$0xff]   ;;  %v110_v4 = vshrl.u32 %v109_v3, 7  ;;  %s1056_s15 = smov [#allocation10]  }
  0x40   :  { %295 = vmatprep.subr.bf16.mxu0 %v877_v13  ;;  %336 = vmatprep.subr.bf16.mxu1 %v879_v14  ;;  %v908_v35 = vld [vmem:[#allocation8 + $0xf8] sm:$0xff]   ;;  %v911_v39 = vld [vmem:[#allocation8 + $0x70] sm:$0xff]   ;;  %v916_v44 = vld [vmem:[#allocation8 + $0xe8] sm:$0xff]   ;;  %s729_s16 = sshll.u32 %s1056_s15, 4  ;;  %s730_s16 = int_to_ptr.vmem [resolvable:$true] %s729_s16 }
  0x41   :  { %v909_v36 = vld [vmem:[#allocation8 + $0x38] sm:$0xff]   ;;  %v912_v40 = vld [vmem:[#allocation8 + $0xf0] sm:$0xff]   ;;  %v917_v45 = vld [vmem:[#allocation8 + $0x28] sm:$0xff]   ;;  %v111_v5 = vsub.s32 0, %v110_v4  ;;  %v119_v6 = vsub.s32 2, %v110_v4  ;;  %v115_v8 = vsub.s32 1, %v110_v4  ;;  %p1024_p7 = scmp.lt.s32.totalorder %s730_s16, %s730_s16 }
  0x42   :  { %v910_v38 = vld [vmem:[#allocation8 + $0xb8] sm:$0xff]   ;;  %v913_v41 = vld [vmem:[#allocation8 + $0x30] sm:$0xff]   ;;  %v918_v46 = vld [vmem:[#allocation8 + $0xa8] sm:$0xff]   ;;  %v123_v9 = vsub.s32 3, %v110_v4  ;;  %s1019_s17 = scalar_lea.vmem %s730_s16, 128 }
  0x43   :  { %296 = vmatpush1.bf16.msra.mxu0 %v881_v15  ;;  %337 = vmatpush1.bf16.msra.mxu1 %v882_v16  ;;  %v914_v42 = vld [vmem:[#allocation8 + $0xb0] sm:$0xff]   ;;  %v919_v47 = vld [vmem:[#allocation8 + $0x60] sm:$0xff]   ;;  %v923_v51 = vld [vmem:[#allocation8 + $0x58] sm:$0xff]   ;;  %p1020_p6 = scmp.ne.s32.totalorder %s730_s16, %s1019_s17  ;;  %p1025_p8 = scmp.lt.s32.totalorder %s1019_s17, %s1019_s17 }
  0x44   :  { %297 = vmatprep.subr.bf16.mxu0 %v883_v17  ;;  %338 = vmatprep.subr.bf16.mxu1 %v885_v18  ;;  %v920_v48 = vld [vmem:[#allocation8 + $0xe0] sm:$0xff]   ;;  %v924_v52 = vld [vmem:[#allocation8 + $0xd8] sm:$0xff]   ;;  %v927_v55 = vld [vmem:[#allocation8 + $0x50] sm:$0xff]  }
  0x45   :  { %v921_v49 = vld [vmem:[#allocation8 + $0x20] sm:$0xff]   ;;  %v925_v53 = vld [vmem:[#allocation8 + $0x18] sm:$0xff]   ;;  %v928_v56 = vld [vmem:[#allocation8 + $0xd0] sm:$0xff]   ;;  %p1026_p9 = por %p1025_p8, %p1024_p7 }
  0x46   :  { %v922_v50 = vld [vmem:[#allocation8 + $0xa0] sm:$0xff]   ;;  %v926_v54 = vld [vmem:[#allocation8 + $0x98] sm:$0xff]   ;;  %v929_v57 = vld [vmem:[#allocation8 + $0x10] sm:$0xff]  }
  0x47   :  { %298 = vmatpush1.bf16.msra.mxu0 %v887_v19  ;;  %339 = vmatpush1.bf16.msra.mxu1 %v888_v20  ;;  %v930_v58 = vld [vmem:[#allocation8 + $0x90] sm:$0xff]   ;;  %v931_v59 = vld [vmem:[#allocation8 + $0x48] sm:$0xff]   ;;  %v935_v63 = vld [vmem:[#allocation8 + $0x40] sm:$0xff]   ;;  %p1027_p10 = pnand %p1026_p9, %p1020_p6 }
  0x48   :  { %299 = vmatprep.subr.bf16.mxu0 %v889_v21  ;;  %340 = vmatprep.subr.bf16.mxu1 %v891_v22  ;;  %v932_v60 = vld [vmem:[#allocation8 + $0xc8] sm:$0xff]   ;;  %v936_v0 = vld [vmem:[#allocation8 + $0xc0] sm:$0xff]   ;;  %v107_v7 = vld [vmem:[#allocation7] sm:$0xf] }
  0x49   :  { %v933_v61 = vld [vmem:[#allocation8 + $0x8] sm:$0xff]   ;;  %v937_v1 = vld [vmem:[#allocation8] sm:$0xff]   ;;  %v112_v10 = vrot.slane %v107_v7, %v111_v5  ;;  %v120_v11 = vrot.slane %v107_v7, %v119_v6  ;;  %v116_v12 = vrot.slane %v107_v7, %v115_v8  ;;  %v124_v13 = vrot.slane %v107_v7, %v123_v9 }
  0x4a   :  { %v934_v62 = vld [vmem:[#allocation8 + $0x88] sm:$0xff]   ;;  %v938_v2 = vld [vmem:[#allocation8 + $0x80] sm:$0xff]  }
  0x4b   :  { %300 = vmatpush1.bf16.msra.mxu0 %v893_v23  ;;  %341 = vmatpush1.bf16.msra.mxu1 %v894_v24 }
  0x4c   :  { %301 = vmatprep.subr.bf16.mxu0 %v895_v25  ;;  %342 = vmatprep.subr.bf16.mxu1 %v897_v26 }
  0x4f   :  { %302 = vmatpush1.bf16.msra.mxu0 %v899_v27  ;;  %343 = vmatpush1.bf16.msra.mxu1 %v900_v28 }
  0x50   :  { %303 = vmatprep.subr.bf16.mxu0 %v901_v29  ;;  %344 = vmatprep.subr.bf16.mxu1 %v903_v30 }
  0x53   :  { %304 = vmatpush1.bf16.msra.mxu0 %v905_v31  ;;  %345 = vmatpush1.bf16.msra.mxu1 %v906_v32 }
  0x54   :  { %805 = vmatprep.subr.bf16.mxu0 %v907_v34  ;;  %827 = vmatprep.subr.bf16.mxu1 %v908_v35 }
  0x56   :  { %322 = vmatmul.mubr.bf16.vlgmr.msra.gmra.mxu0 %v74_v37  ;;  %363 = vmatmul.mubr.bf16.vlgmr.msra.gmra.mxu1 %v74_v37 }
  0x57   :  { %806 = vmatpush3.bf16.msra.mxu0 %v909_v36  ;;  %828 = vmatpush3.bf16.msra.mxu1 %v910_v38  ;;  %v772_v36 = vld [vmem:[%s1109_s4] ss:$0 sm:$0xff] }
  0x58   :  { %807 = vmatprep.subr.bf16.mxu0 %v911_v39  ;;  %829 = vmatprep.subr.bf16.mxu1 %v912_v40 }
  0x5b   :  { %808 = vmatpush3.bf16.msra.mxu0 %v913_v41  ;;  %830 = vmatpush3.bf16.msra.mxu1 %v914_v42 }
  0x5c   :  { %809 = vmatprep.subr.bf16.mxu0 %v915_v43  ;;  %831 = vmatprep.subr.bf16.mxu1 %v916_v44 }
  0x5f   :  { %810 = vmatpush3.bf16.msra.mxu0 %v917_v45  ;;  %832 = vmatpush3.bf16.msra.mxu1 %v918_v46 }
  0x60   :  { %811 = vmatprep.subr.bf16.mxu0 %v919_v47  ;;  %833 = vmatprep.subr.bf16.mxu1 %v920_v48 }
  0x63   :  { %812 = vmatpush3.bf16.msra.mxu0 %v921_v49  ;;  %834 = vmatpush3.bf16.msra.mxu1 %v922_v50 }
  0x64   :  { %813 = vmatprep.subr.bf16.mxu0 %v923_v51  ;;  %835 = vmatprep.subr.bf16.mxu1 %v924_v52 }
  0x67   :  { %814 = vmatpush3.bf16.msra.mxu0 %v925_v53  ;;  %836 = vmatpush3.bf16.msra.mxu1 %v926_v54 }
  0x68   :  { %815 = vmatprep.subr.bf16.mxu0 %v927_v55  ;;  %837 = vmatprep.subr.bf16.mxu1 %v928_v56 }
  0x6b   :  { %816 = vmatpush3.bf16.msra.mxu0 %v929_v57  ;;  %838 = vmatpush3.bf16.msra.mxu1 %v930_v58 }
  0x6c   :  { %817 = vmatprep.subr.bf16.mxu0 %v931_v59  ;;  %839 = vmatprep.subr.bf16.mxu1 %v932_v60 }
  0x6f   :  { %818 = vmatpush3.bf16.msra.mxu0 %v933_v61  ;;  %840 = vmatpush3.bf16.msra.mxu1 %v934_v62 }
  0x70   :  { %819 = vmatprep.subr.bf16.mxu0 %v935_v63  ;;  %841 = vmatprep.subr.bf16.mxu1 %v936_v0 }
  0x73   :  { %820 = vmatpush3.bf16.msra.mxu0 %v937_v1  ;;  %842 = vmatpush3.bf16.msra.mxu1 %v938_v2 }
 0x116   :  { %v323_v14 = vpop.f32.mrf.mxu0  ;;  %v364_v15 = vpop.f32.mrf.mxu1 }
 0x117   :  { %v324_v16 = vadd.f32 %v323_v14, %v112_v10  ;;  %v365_v17 = vadd.f32 %v364_v15, %v120_v11 }
 0x118   :  { %v325_v18 = vpop.f32.mrf.mxu0  ;;  %v366_v19 = vpop.f32.mrf.mxu1 }
 0x119   :  { %v373_v20 = vmax.f32 %v365_v17, 0.0  ;;  %v326_v21 = vadd.f32 %v325_v18, %v116_v12  ;;  %v367_v22 = vadd.f32 %v366_v19, %v124_v13  ;;  %v371_v23 = vmax.f32 %v324_v16, 0.0 }
 0x11a   :  { %v327_v24 = vpop.f32.mrf.mxu0  ;;  %v368_v25 = vpop.f32.mrf.mxu1 }
 0x11b   :  { %v372_v26 = vmax.f32 %v326_v21, 0.0  ;;  %v374_v27 = vmax.f32 %v367_v22, 0.0  ;;  %v377_v28 = vpack.c.bf16 %v373_v20, %v373_v20  ;;  %v375_v33 = vpack.c.bf16 %v371_v23, %v371_v23 }
 0x11c   :  { %v328_v29 = vpop.f32.mrf.mxu0  ;;  %v369_v30 = vpop.f32.mrf.mxu1 }
 0x11d   :  { %v376_v31 = vpack.c.bf16 %v372_v26, %v372_v26  ;;  %v378_v32 = vpack.c.bf16 %v374_v27, %v374_v27 }
 0x11f   :  { %674 = vmatprep.mubr.bf16.mxu0 %v376_v31  ;;  %714 = vmatprep.mubr.bf16.mxu1 %v378_v32 }
 0x120   :  { %675 = vmatmul.mubr.bf16.vlgmr.msra.gmra.mxu0 %v375_v33  ;;  %715 = vmatmul.mubr.bf16.vlgmr.msra.gmra.mxu1 %v377_v28 }
 0x1e0   :  { %v821_v34 = vpop.f32.mrf.mxu0  ;;  %v843_v35 = vpop.f32.mrf.mxu1 }
 0x1e2   :  { %v822_v37 = vpop.f32.mrf.mxu0  ;;  %v844_v38 = vpop.f32.mrf.mxu1 }
 0x1e3   :  { %v823_v39 = vadd.f32 %v822_v37, %v821_v34  ;;  %v845_v43 = vadd.f32 %v844_v38, %v843_v35 }
 0x1e4   :  { %v824_v40 = vpop.f32.mrf.mxu0  ;;  %v846_v41 = vpop.f32.mrf.mxu1 }
 0x1e5   :  { %v677_v42 = vadd.f32 %v823_v39, %v772_v36 }
 0x1e6   :  { %v825_v44 = vpop.f32.mrf.mxu0  ;;  %v847_v45 = vpop.f32.mrf.mxu1 }
 0x1e7   :  { %v717_v46 = vadd.f32 %v845_v43, %v677_v42 }
 0x1e9   :  { %722 = vst [vmem:[#allocation10] sm:$0xff] %v717_v46 }
 0x1ea   :  { %1030 = shalt.err (!%p1027_p10)
}
 0x1eb   :  { %732 = dma.vmem_to_hbm [thread:$0]  %s730_s16, 128, %s1110_s5, [#allocation4]  }
 0x1ec   :  { %1045 = dma.done.wait [#allocation4], 128  }
 0x1ed   :  { %1046 = vsyncadd [#allocation4], 4294967168 }
 0x1ee   :  { %736 = vsyncpa [#allocation3], 1 }
 0x1ef   :  { %737 = vsyncpa [#allocation6], 1 }
 0x1f0   :  { %738 = vsyncpa [#allocation9], 1 }
 0x1f1   :  { %739 = vsyncpa [#allocation4], 1 }

</bundles_post_ra>
